<compile_context>
chip_gen: v7x
topology: tpu7x:2x2x1
jax: 0.10.0
libtpu: 0.0.40
codegen_flags: <defaults>
</compile_context>

<pallas_src>
import functools

import jax
import jax.numpy as jnp
from jax.experimental import pallas as pl
from jax.experimental.pallas import tpu as pltpu


def _tree_sum(terms):
    """Pairwise-tree sum of a short list of arrays (short dependency chains)."""
    terms = list(terms)
    while len(terms) > 1:
        nxt = [terms[i] + terms[i + 1] for i in range(0, len(terms) - 1, 2)]
        if len(terms) % 2:
            nxt.append(terms[-1])
        terms = nxt
    return terms[0]


def _decomp_kernel(x_ref, res_ref, mean_ref, *, kernel_size, pad):
    # x_ref / res_ref / mean_ref: (L, n_lanes) — time on sublanes, B*C on lanes.
    L, n = x_ref.shape
    k = kernel_size
    x = x_ref[...].astype(jnp.float32)  # single load of the tile

    # Replicate-pad along the time (sublane) axis, VMEM only (never in HBM).
    if pad > 0:
        first = jnp.broadcast_to(x[0:1, :], (pad, n))
        last = jnp.broadcast_to(x[L - 1:L, :], (pad, n))
        xpad = jnp.concatenate([first, x, last], axis=0)  # (L + 2*pad, n)
    else:
        xpad = x

    if k <= 8:
        # Few offsets: direct slices + pairwise tree is already cheap.
        total = _tree_sum([xpad[d:d + L, :] for d in range(k)])
    else:
        # Phase-grouped sliding sum (group offsets by offset mod 8):
        #   total[t] = sum_{r=0..7} Hq[t + r] + sum_{r=0..s-1} xpad[t + 8q + r]
        # where k = 8q + s and Hq[t] = sum_{m=0..q-1} xpad[t + 8m] uses only
        # sublane-ALIGNED slices (offsets 0, 8, 16, ...).
        q, s = divmod(k, 8)                       # q >= 1
        Lh = L + 7                                # Hq must cover t + r, r < 8
        hq_terms = [xpad[8 * m: 8 * m + Lh, :] for m in range(q)]
        Hq = _tree_sum(hq_terms)                  # (Lh, n), f32
        group_terms = [Hq[r:r + L, :] for r in range(8)]          # 1 aligned + 7 shifted
        group_terms += [xpad[8 * q + r: 8 * q + r + L, :] for r in range(s)]
        total = _tree_sum(group_terms)

    mean = total * (1.0 / k)
    mean_ref[...] = mean.astype(mean_ref.dtype)
    res_ref[...] = (x - mean).astype(res_ref.dtype)


def _pick_lane_tile(N, target_steps=8, max_tile=1024):
    """Lane tile: multiple of 128, <= max_tile (v7x VMEM), and small enough
    that the parallel grid axis has several steps (pipelining + megacore)."""
    if N <= 128:
        return N                                  # block dim == array dim: legal
    tile = -(-N // target_steps)                  # cdiv
    tile = ((tile + 127) // 128) * 128            # round up to multiple of 128
    return max(128, min(tile, max_tile))


def series_decomp_2d(x2d, kernel_size):
    """Native lane-dense entry point.  x2d: (L, N) with N = B*C on lanes.

    Returns (res2d, moving_mean2d), both (L, N).  Use this directly (no HBM
    transposes) when the consumer can work in the (L, B*C) layout.
    """
    L, N = x2d.shape
    pad = (kernel_size - 1) // 2
    # AvgPool1d(kernel, stride=1, padding=0) on L + 2*pad must give back L:
    assert (L + 2 * pad) - kernel_size + 1 == L, (
        "series_decomp expects odd kernel_size (DLinear usage)")

    lane_tile = _pick_lane_tile(N)
    grid = (pl.cdiv(N, lane_tile),)

    kernel = functools.partial(_decomp_kernel, kernel_size=kernel_size, pad=pad)
    spec = pl.BlockSpec((L, lane_tile), lambda j: (0, j))

    out_shape = (
        jax.ShapeDtypeStruct((L, N), x2d.dtype),  # res
        jax.ShapeDtypeStruct((L, N), x2d.dtype),  # moving_mean
    )

    res2d, mean2d = pl.pallas_call(
        kernel,
        out_shape=out_shape,
        grid=grid,
        in_specs=[spec],
        out_specs=(spec, spec),
        compiler_params=pltpu.CompilerParams(
            dimension_semantics=("parallel",),
            vmem_limit_bytes=64 * 1024 * 1024,
        ),
    )(x2d)
    return res2d, mean2d


def series_decomp(x, kernel_size):
    """x: (B, L, C) float array. Returns (res, moving_mean), both (B, L, C)."""
    B, L, C = x.shape
    N = B * C
    # TODO(synk): in the full DLinear model keep activations in the (L, B*C)
    # layout end-to-end (its Linear layers act along L, so they can consume it
    # via dot_general dimension_numbers); then these HBM transposes vanish and
    # only the kernel's 3 HBM passes remain.  They are kept here only to honor
    # the standalone (B, L, C) module interface.
    x2d = jnp.transpose(x, (1, 0, 2)).reshape(L, N)
    res2d, mean2d = series_decomp_2d(x2d, kernel_size)
    res = jnp.transpose(res2d.reshape(L, B, C), (1, 0, 2))
    mean = jnp.transpose(mean2d.reshape(L, B, C), (1, 0, 2))
    return res, mean


def _reference(x, kernel_size):
    # Pure-JAX reference mirroring the PyTorch forward.
    pad = (kernel_size - 1) // 2
    front = jnp.repeat(x[:, 0:1, :], pad, axis=1)
    end = jnp.repeat(x[:, -1:, :], pad, axis=1)
    xp = jnp.concatenate([front, x, end], axis=1)
    L = x.shape[1]
    windows = jnp.stack([xp[:, j:j + L, :] for j in range(kernel_size)], axis=0)
    mean = jnp.mean(windows, axis=0)
    return x - mean, mean


if __name__ == "__main__":
    key = jax.random.PRNGKey(0)

    configs = [
        # (B, L, C, kernel_size)
        (2, 16, 8, 5),     # small smoke test, k <= 8 path, single lane block
        (2, 36, 7, 25),    # realistic DLinear kernel_size, tiny lane count
        (32, 48, 7, 25),   # N = 224 > 128: multi-step parallel grid + partial block
    ]

    ok = True
    for i, (B, L, C, k) in enumerate(configs):
        x = jax.random.normal(jax.random.fold_in(key, i), (B, L, C),
                              dtype=jnp.float32)
        res, mean = series_decomp(x, k)
        res = jax.block_until_ready(res)
        mean = jax.block_until_ready(mean)

        res_ref, mean_ref = _reference(x, k)
        ok &= bool(jnp.allclose(res, res_ref, atol=2e-5, rtol=1e-5))
        ok &= bool(jnp.allclose(mean, mean_ref, atol=2e-5, rtol=1e-5))
        ok &= bool(jnp.allclose(res + mean, x, atol=2e-5, rtol=1e-5))

    assert ok
    print("KERNEL_OK")
</pallas_src>

<mosaic_0001>
module attributes {stable_mosaic.version = 11 : i64} {
  func.func @_decomp_kernel(%arg0: i32, %arg1: memref<16x16xf32, #tpu.memory_space<vmem>>, %arg2: memref<16x16xf32, #tpu.memory_space<vmem>>, %arg3: memref<16x16xf32, #tpu.memory_space<vmem>>) attributes {dimension_semantics = [#tpu.dimension_semantics<parallel>], iteration_bounds = array<i64: 1>, scalar_prefetch = 0 : i64, scratch_operands = 0 : i64, tpu.core_type = #tpu.core_type<tc>, window_params = [{transform_indices = @transform_0, window_bounds = array<i64: 16, 16>}, {transform_indices = @transform_1, window_bounds = array<i64: 16, 16>}, {transform_indices = @transform_2, window_bounds = array<i64: 16, 16>}]} {
    %c0 = arith.constant 0 : index
    %c0_0 = arith.constant 0 : index
    %0 = vector.load %arg1[%c0, %c0_0] : memref<16x16xf32, #tpu.memory_space<vmem>>, vector<16x16xf32>
    %1 = vector.extract_strided_slice %0 {offsets = [0, 0], sizes = [1, 16], strides = [1, 1]} : vector<16x16xf32> to vector<1x16xf32>
    %2 = vector.shape_cast %1 : vector<1x16xf32> to vector<1x16xf32>
    %3 = vector.broadcast %2 : vector<1x16xf32> to vector<2x16xf32>
    %4 = vector.extract_strided_slice %0 {offsets = [15, 0], sizes = [1, 16], strides = [1, 1]} : vector<16x16xf32> to vector<1x16xf32>
    %5 = vector.shape_cast %4 : vector<1x16xf32> to vector<1x16xf32>
    %6 = vector.broadcast %5 : vector<1x16xf32> to vector<2x16xf32>
    %7 = tpu.concatenate %3, %0, %6 in 0 : vector<2x16xf32>, vector<16x16xf32>, vector<2x16xf32> -> vector<20x16xf32>
    %8 = vector.extract_strided_slice %7 {offsets = [0, 0], sizes = [16, 16], strides = [1, 1]} : vector<20x16xf32> to vector<16x16xf32>
    %9 = vector.extract_strided_slice %7 {offsets = [1, 0], sizes = [16, 16], strides = [1, 1]} : vector<20x16xf32> to vector<16x16xf32>
    %10 = vector.extract_strided_slice %7 {offsets = [2, 0], sizes = [16, 16], strides = [1, 1]} : vector<20x16xf32> to vector<16x16xf32>
    %11 = vector.extract_strided_slice %7 {offsets = [3, 0], sizes = [16, 16], strides = [1, 1]} : vector<20x16xf32> to vector<16x16xf32>
    %12 = vector.extract_strided_slice %7 {offsets = [4, 0], sizes = [16, 16], strides = [1, 1]} : vector<20x16xf32> to vector<16x16xf32>
    %13 = arith.addf %8, %9 : vector<16x16xf32>
    %14 = arith.addf %10, %11 : vector<16x16xf32>
    %15 = arith.addf %13, %14 : vector<16x16xf32>
    %16 = arith.addf %15, %12 : vector<16x16xf32>
    %cst = arith.constant 2.000000e-01 : f32
    %17 = vector.broadcast %cst : f32 to vector<16x16xf32>
    %18 = arith.mulf %16, %17 : vector<16x16xf32>
    %c0_1 = arith.constant 0 : index
    %c0_2 = arith.constant 0 : index
    %19 = vector.load %arg3[%c0_1, %c0_2] : memref<16x16xf32, #tpu.memory_space<vmem>>, vector<16x16xf32>
    tpu.vector_store %arg3[%c0_1, %c0_2], %18 {strides = array<i32>} : memref<16x16xf32, #tpu.memory_space<vmem>>, vector<16x16xf32>,
    %20 = arith.subf %0, %18 : vector<16x16xf32>
    %c0_3 = arith.constant 0 : index
    %c0_4 = arith.constant 0 : index
    %21 = vector.load %arg2[%c0_3, %c0_4] : memref<16x16xf32, #tpu.memory_space<vmem>>, vector<16x16xf32>
    tpu.vector_store %arg2[%c0_3, %c0_4], %20 {strides = array<i32>} : memref<16x16xf32, #tpu.memory_space<vmem>>, vector<16x16xf32>,
    return
  }
  func.func @transform_0(%arg0: i32) -> (i32, i32) {
    %c0_i32 = arith.constant 0 : i32
    %c0_i32_0 = arith.constant 0 : i32
    return %c0_i32, %arg0 : i32, i32
  }
  func.func @transform_1(%arg0: i32) -> (i32, i32) {
    %c0_i32 = arith.constant 0 : i32
    %c0_i32_0 = arith.constant 0 : i32
    return %c0_i32, %arg0 : i32, i32
  }
  func.func @transform_2(%arg0: i32) -> (i32, i32) {
    %c0_i32 = arith.constant 0 : i32
    %c0_i32_0 = arith.constant 0 : i32
    return %c0_i32, %arg0 : i32, i32
  }
}

</mosaic_0001>

<bundles_post_ra>
// kernel: tpu_custom_call.1
= control target key start
LH: loop header
LB: loop body
LE: loop exit
PB: predicated region body
PF: predicated region fallthrough
CT: control target
= control target key end

     0   :  { %8 = vsyncpa [#allocation3], 0  ;;  %s279_s0 = inlined_call_operand.hbm [shape: f32[16,16], index: 0, kind: input, shape index: {}]   ;;  %s280_s1 = inlined_call_operand.hbm [shape: f32[16,16], index: 1, kind: output, shape index: {0}]   ;;  %s281_s2 = inlined_call_operand.hbm [shape: f32[16,16], index: 2, kind: output, shape index: {1}]  }
   0x1   :  { %9 = vsyncpa [#allocation4], 0 }
   0x2   :  { %10 = vsyncpa [#allocation7], 0  ;;  %s203_s9 = smov [#allocation2]   ;;  %s131_s13 = scalar_lea.hbm %s279_s0, 256 }
   0x3   :  { %s16_s10 = sshll.u32 %s203_s9, 4  ;;  %p132_p0 = scmp.ne.s32.totalorder %s279_s0, %s131_s13  ;;  %s17_s10 = int_to_ptr.vmem [resolvable:$true] %s16_s10 }
   0x4   :  { %p135_p1 = scmp.lt.u32.totalorder %s131_s13, %s279_s0 }
   0x6   :  { %p137_p2 = pnand %p135_p1, %p132_p0 }
   0x8   :  { %140 = shalt.err (!%p137_p2)
}
   0x9   :  { %s141_s18 = scalar_lea.vmem %s17_s10, 256  ;;  %p146_p4 = scmp.lt.s32.totalorder %s17_s10, %s17_s10 }
   0xa   :  { %p142_p3 = scmp.ne.s32.totalorder %s17_s10, %s141_s18  ;;  %p147_p5 = scmp.lt.s32.totalorder %s141_s18, %s141_s18 }
   0xc   :  { %p148_p6 = por %p147_p5, %p146_p4 }
   0xe   :  { %p149_p7 = pnand %p148_p6, %p142_p3 }
  0x10   :  { %152 = shalt.err (!%p149_p7)
}
  0x11   :  { %s204_s19 = smov 128   ;;  %s205_s20 = smov 8  }
  0x12   :  { %22 = dma.hbm_to_vmem [thread:$0]  %s279_s0, 256, %s17_s10, [#allocation3], %s204_s19, %s204_s19, %s205_s20  }
  0x13   :  { %197 = dma.done.wait [#allocation3], 256  }
  0x14   :  { %198 = vsyncadd [#allocation3], 4294967040  ;;  %v28_v0 = vlaneseq  ;;  %v26_v4 = vld [vmem:[#allocation2] sm:$0xff]  ;;  %v27_v5 = vld [vmem:[#allocation2 + $0x8] sm:$0xff]  ;;  %vm38_vm0 = vcmask 1041408   ;;  %vm49_vm1 = vcmask 1046528  }
  0x15   :  { %v39_v8 = vrot.slane %v26_v4, 6  ;;  %v40_v9 = vrot.slane %v27_v5, 6  ;;  %vm64_vm2 = vcmask 1045504   ;;  %vm74_vm3 = vcmask 1043456   ;;  %s206_s0 = smov [#allocation6]   ;;  %s207_s24 = smov [#allocation5]  }
  0x16   :  { %v29_v1 = vshrl.u32 %v28_v0, 7  ;;  %s110_s23 = sshll.u32 %s206_s0, 4  ;;  %vm86_vm4 = vcmask 130048   ;;  %s98_s25 = sshll.u32 %s207_s24, 4  ;;  %s111_s23 = int_to_ptr.vmem [resolvable:$true] %s110_s23  ;;  %s240_s25 = int_to_ptr.vmem [resolvable:$true] %s98_s25 }
  0x17   :  { %v41_v10 = vsel %vm38_vm0, %v39_v8, %v40_v9  ;;  %s153_s26 = scalar_lea.vmem %s111_s23, 256  ;;  %p158_p9 = scmp.lt.s32.totalorder %s111_s23, %s111_s23 }
  0x18   :  { %v30_v2 = vsub.s32 0, %v29_v1  ;;  %v34_v3 = vsub.s32 7, %v29_v1  ;;  %v51_v14 = vrot.slane %v41_v10, 1  ;;  %v76_v22 = vrot.slane %v41_v10, 4  ;;  %p154_p8 = scmp.ne.s32.totalorder %s111_s23, %s153_s26  ;;  %p159_p10 = scmp.lt.s32.totalorder %s153_s26, %s153_s26 }
  0x1a   :  { %v31_v6 = vrot.slane %v26_v4, %v30_v2  ;;  %v35_v7 = vrot.slane %v27_v5, %v34_v3  ;;  %p160_p11 = por %p159_p10, %p158_p9 }
  0x1c   :  { %v45_v11 = vsel %vm38_vm0, %v31_v6, %v39_v8  ;;  %v46_v12 = vsel %vm38_vm0, %v40_v9, %v35_v7  ;;  %p161_p12 = pnand %p160_p11, %p154_p8 }
  0x1d   :  { %v50_v13 = vrot.slane %v45_v11, 1  ;;  %v53_v15 = vrot.slane %v46_v12, 1  ;;  %v75_v18 = vrot.slane %v45_v11, 4  ;;  %v78_v23 = vrot.slane %v46_v12, 4 }
  0x1f   :  { %v52_v16 = vsel %vm49_vm1, %v50_v13, %v51_v14  ;;  %v54_v17 = vsel %vm49_vm1, %v51_v14, %v53_v15  ;;  %v60_v19 = vadd.f32 %v53_v15, %v46_v12  ;;  %v77_v28 = vsel %vm74_vm3, %v75_v18, %v76_v22 }
  0x20   :  { %v57_v20 = vadd.f32 %v52_v16, %v45_v11  ;;  %v58_v21 = vadd.f32 %v54_v17, %v41_v10  ;;  %v79_v30 = vsel %vm74_vm3, %v76_v22, %v78_v23 }
  0x21   :  { %v68_v24 = vrot.slane %v60_v19, 2 }
  0x22   :  { %v65_v25 = vrot.slane %v57_v20, 2  ;;  %v66_v26 = vrot.slane %v58_v21, 2 }
  0x24   :  { %v67_v27 = vsel %vm64_vm2, %v65_v25, %v66_v26  ;;  %v69_v29 = vsel %vm64_vm2, %v66_v26, %v68_v24 }
  0x25   :  { %v72_v31 = vadd.f32 %v67_v27, %v57_v20  ;;  %v73_v32 = vadd.f32 %v69_v29, %v58_v21 }
  0x27   :  { %v82_v33 = vadd.f32 %v77_v28, %v72_v31  ;;  %v83_v34 = vadd.f32 %v79_v30, %v73_v32 }
  0x29   :  { %v84_v35 = vmul.f32 0.2, %v82_v33  ;;  %v85_v36 = vmul.f32 0.2, %v83_v34 }
  0x2b   :  { %87 = vst.msk [vmem:[#allocation6] sm:$0xff] %vm86_vm4, %v84_v35  ;;  %88 = vst.msk [vmem:[#allocation6 + $0x8] sm:$0xff] %vm86_vm4, %v85_v36  ;;  %v89_v37 = vsub.f32 %v26_v4, %v84_v35  ;;  %v90_v38 = vsub.f32 %v27_v5, %v85_v36 }
  0x2c   :  { %164 = shalt.err (!%p161_p12)
}
  0x2d   :  { %s165_s29 = scalar_lea.hbm %s281_s2, 256 }
  0x2e   :  { %p166_p13 = scmp.ne.s32.totalorder %s281_s2, %s165_s29  ;;  %p169_p0 = scmp.lt.u32.totalorder %s165_s29, %s281_s2 }
  0x30   :  { %p171_p1 = pnand %p169_p0, %p166_p13 }
  0x32   :  { %174 = shalt.err (!%p171_p1)
}
  0x33   :  { %116 = dma.vmem_to_hbm [thread:$0]  %s111_s23, 256, %s281_s2, [#allocation7], %s204_s19, %s204_s19, %s205_s20   ;;  %91 = vst.msk [vmem:[#allocation5] sm:$0xff] %vm86_vm4, %v89_v37  ;;  %92 = vst.msk [vmem:[#allocation5 + $0x8] sm:$0xff] %vm86_vm4, %v90_v38 }
  0x34   :  { %s175_s8 = scalar_lea.vmem %s240_s25, 256  ;;  %p180_p3 = scmp.lt.s32.totalorder %s240_s25, %s240_s25 }
  0x35   :  { %p176_p2 = scmp.ne.s32.totalorder %s240_s25, %s175_s8  ;;  %p181_p4 = scmp.lt.s32.totalorder %s175_s8, %s175_s8 }
  0x37   :  { %p182_p5 = por %p181_p4, %p180_p3 }
  0x39   :  { %p183_p6 = pnand %p182_p5, %p176_p2 }
  0x3b   :  { %186 = shalt.err (!%p183_p6)
}
  0x3c   :  { %s187_s11 = scalar_lea.hbm %s280_s1, 256 }
  0x3d   :  { %p188_p7 = scmp.ne.s32.totalorder %s280_s1, %s187_s11  ;;  %p191_p8 = scmp.lt.u32.totalorder %s187_s11, %s280_s1 }
  0x3f   :  { %p193_p9 = pnand %p191_p8, %p188_p7 }
  0x41   :  { %196 = shalt.err (!%p193_p9)
}
  0x42   :  { %104 = dma.vmem_to_hbm [thread:$0]  %s240_s25, 256, %s280_s1, [#allocation4], %s204_s19, %s204_s19, %s205_s20  }
  0x43   :  { %199 = dma.done.wait [#allocation4], 256  }
  0x44   :  { %200 = vsyncadd [#allocation4], 4294967040 }
  0x45   :  { %201 = dma.done.wait [#allocation7], 256  }
  0x46   :  { %202 = vsyncadd [#allocation7], 4294967040 }
  0x47   :  { %123 = vsyncpa [#allocation3], 1 }
  0x48   :  { %124 = vsyncpa [#allocation4], 1 }
  0x49   :  { %125 = vsyncpa [#allocation7], 1 }

</bundles_post_ra>
